<compile_context>
chip_gen: v7x
topology: tpu7x:2x2x1
jax: 0.10.0
libtpu: 0.0.40
codegen_flags: <defaults>
</compile_context>

<pallas_src>
import functools

import jax
import jax.numpy as jnp
from jax.experimental import pallas as pl
from jax.experimental.pallas import tpu as pltpu


def _pe_kernel(x_ref, o_ref, *, num_res: int):
    """PE on a (TM, D) tile -> (TM, D*(1+2*num_res)) tile, single dense store."""
    x = x_ref[...]                                   # (TM, D)
    d = x.shape[-1]

    # Band-vectorized argument: band r occupies columns [r*d, (r+1)*d).
    # 2.0**r is an exact Python float, so numerics match the reference exactly.
    xr = jnp.concatenate([x * (2.0 ** r) for r in range(num_res)], axis=-1)
    s = jnp.sin(xr)                                  # (TM, num_res*D) - one wide EUP call
    c = jnp.cos(xr)                                  # (TM, num_res*D) - one wide EUP call

    # Assemble [x, sin0, cos0, sin1, cos1, ...] in VMEM, then one lane-dense store.
    bands = [x]
    for r in range(num_res):
        bands.append(s[:, r * d:(r + 1) * d])
        bands.append(c[:, r * d:(r + 1) * d])
    o_ref[...] = jnp.concatenate(bands, axis=-1)     # (TM, D*(1+2*num_res))


def positional_encoding(x: jnp.ndarray, num_res: int = 6,
                        row_block: int = 1024) -> jnp.ndarray:
    """Pallas TPU implementation of PE.forward: concat [x, sin(x*2^r), cos(x*2^r)] on last dim."""
    orig_shape = x.shape
    d = orig_shape[-1]
    d_out = d * (1 + 2 * num_res)

    x2 = x.reshape(-1, d)                            # (N, D)
    n = x2.shape[0]

    # Clamp the row block to the (8-aligned) problem size so tiny inputs don't
    # allocate oversized VMEM tiles; block row dim stays a multiple of 8.
    rb = min(row_block, max(8, ((n + 7) // 8) * 8))
    grid = (pl.cdiv(n, rb),)                         # partial last block is masked by Pallas

    # VMEM use at rb=1024, D=16, f32: ~64KB in + ~832KB out per buffer, ~1.8MB
    # double-buffered -> comfortably under the scoped default on v5e/v6e/v7x,
    # so no vmem_limit_bytes override needed.  On v7x keep grid >= a few x 2
    # steps so the "parallel" axis shards across both TensorCores (true for any
    # realistically sized input at rb=1024).
    out = pl.pallas_call(
        functools.partial(_pe_kernel, num_res=num_res),
        out_shape=jax.ShapeDtypeStruct((n, d_out), x.dtype),
        grid_spec=pltpu.PrefetchScalarGridSpec(
            num_scalar_prefetch=0,
            grid=grid,
            in_specs=[pl.BlockSpec((rb, d), lambda i: (i, 0))],
            out_specs=pl.BlockSpec((rb, d_out), lambda i: (i, 0)),
        ),
        compiler_params=pltpu.CompilerParams(
            dimension_semantics=("parallel",)),
    )(x2)

    return out.reshape(*orig_shape[:-1], d_out)


def _reference_pe(x, num_res=6):
    outs = [x]
    for r in range(num_res):
        outs.append(jnp.sin(x * 2 ** r))
        outs.append(jnp.cos(x * 2 ** r))
    return jnp.concatenate(outs, axis=-1)


if __name__ == "__main__":
    key = jax.random.PRNGKey(0)
    num_res = 6

    # Small shapes consistent with a PE input: batch=2, seq=8, features=16.
    x = jax.random.normal(key, (2, 8, 16), dtype=jnp.float32)
    out = jax.block_until_ready(positional_encoding(x, num_res=num_res))
    ref = _reference_pe(x, num_res=num_res)
    assert out.shape == ref.shape, (out.shape, ref.shape)
    assert jnp.allclose(out, ref, atol=1e-5, rtol=1e-5), "mismatch vs reference"

    # Ragged row count (n=15, not a multiple of 8) exercises the masked partial block.
    x_ragged = jax.random.normal(jax.random.PRNGKey(1), (3, 5, 16), dtype=jnp.float32)
    out_r = jax.block_until_ready(positional_encoding(x_ragged, num_res=num_res))
    ref_r = _reference_pe(x_ragged, num_res=num_res)
    assert out_r.shape == ref_r.shape, (out_r.shape, ref_r.shape)
    assert jnp.allclose(out_r, ref_r, atol=1e-5, rtol=1e-5), "mismatch vs reference (ragged)"

    print("KERNEL_OK")
</pallas_src>

<mosaic_0001>
module attributes {stable_mosaic.version = 11 : i64} {
  func.func @_pe_kernel(%arg0: i32, %arg1: memref<16x16xf32, #tpu.memory_space<vmem>>, %arg2: memref<16x208xf32, #tpu.memory_space<vmem>>) attributes {dimension_semantics = [#tpu.dimension_semantics<parallel>], iteration_bounds = array<i64: 1>, scalar_prefetch = 0 : i64, scratch_operands = 0 : i64, tpu.core_type = #tpu.core_type<tc>, window_params = [{transform_indices = @transform_0, window_bounds = array<i64: 16, 16>}, {transform_indices = @transform_1, window_bounds = array<i64: 16, 208>}]} {
    %c0 = arith.constant 0 : index
    %c0_0 = arith.constant 0 : index
    %0 = vector.load %arg1[%c0, %c0_0] : memref<16x16xf32, #tpu.memory_space<vmem>>, vector<16x16xf32>
    %cst = arith.constant 1.000000e+00 : f32
    %1 = vector.broadcast %cst : f32 to vector<16x16xf32>
    %2 = arith.mulf %0, %1 : vector<16x16xf32>
    %cst_1 = arith.constant 2.000000e+00 : f32
    %3 = vector.broadcast %cst_1 : f32 to vector<16x16xf32>
    %4 = arith.mulf %0, %3 : vector<16x16xf32>
    %cst_2 = arith.constant 4.000000e+00 : f32
    %5 = vector.broadcast %cst_2 : f32 to vector<16x16xf32>
    %6 = arith.mulf %0, %5 : vector<16x16xf32>
    %cst_3 = arith.constant 8.000000e+00 : f32
    %7 = vector.broadcast %cst_3 : f32 to vector<16x16xf32>
    %8 = arith.mulf %0, %7 : vector<16x16xf32>
    %cst_4 = arith.constant 1.600000e+01 : f32
    %9 = vector.broadcast %cst_4 : f32 to vector<16x16xf32>
    %10 = arith.mulf %0, %9 : vector<16x16xf32>
    %cst_5 = arith.constant 3.200000e+01 : f32
    %11 = vector.broadcast %cst_5 : f32 to vector<16x16xf32>
    %12 = arith.mulf %0, %11 : vector<16x16xf32>
    %13 = tpu.concatenate %2, %4, %6, %8, %10, %12 in 1 : vector<16x16xf32>, vector<16x16xf32>, vector<16x16xf32>, vector<16x16xf32>, vector<16x16xf32>, vector<16x16xf32> -> vector<16x96xf32>
    %14 = math.sin %13 : vector<16x96xf32>
    %15 = math.cos %13 : vector<16x96xf32>
    %16 = vector.extract_strided_slice %14 {offsets = [0, 0], sizes = [16, 16], strides = [1, 1]} : vector<16x96xf32> to vector<16x16xf32>
    %17 = vector.extract_strided_slice %15 {offsets = [0, 0], sizes = [16, 16], strides = [1, 1]} : vector<16x96xf32> to vector<16x16xf32>
    %18 = vector.extract_strided_slice %14 {offsets = [0, 16], sizes = [16, 16], strides = [1, 1]} : vector<16x96xf32> to vector<16x16xf32>
    %19 = vector.extract_strided_slice %15 {offsets = [0, 16], sizes = [16, 16], strides = [1, 1]} : vector<16x96xf32> to vector<16x16xf32>
    %20 = vector.extract_strided_slice %14 {offsets = [0, 32], sizes = [16, 16], strides = [1, 1]} : vector<16x96xf32> to vector<16x16xf32>
    %21 = vector.extract_strided_slice %15 {offsets = [0, 32], sizes = [16, 16], strides = [1, 1]} : vector<16x96xf32> to vector<16x16xf32>
    %22 = vector.extract_strided_slice %14 {offsets = [0, 48], sizes = [16, 16], strides = [1, 1]} : vector<16x96xf32> to vector<16x16xf32>
    %23 = vector.extract_strided_slice %15 {offsets = [0, 48], sizes = [16, 16], strides = [1, 1]} : vector<16x96xf32> to vector<16x16xf32>
    %24 = vector.extract_strided_slice %14 {offsets = [0, 64], sizes = [16, 16], strides = [1, 1]} : vector<16x96xf32> to vector<16x16xf32>
    %25 = vector.extract_strided_slice %15 {offsets = [0, 64], sizes = [16, 16], strides = [1, 1]} : vector<16x96xf32> to vector<16x16xf32>
    %26 = vector.extract_strided_slice %14 {offsets = [0, 80], sizes = [16, 16], strides = [1, 1]} : vector<16x96xf32> to vector<16x16xf32>
    %27 = vector.extract_strided_slice %15 {offsets = [0, 80], sizes = [16, 16], strides = [1, 1]} : vector<16x96xf32> to vector<16x16xf32>
    %28 = tpu.concatenate %0, %16, %17, %18, %19, %20, %21, %22, %23, %24, %25, %26, %27 in 1 : vector<16x16xf32>, vector<16x16xf32>, vector<16x16xf32>, vector<16x16xf32>, vector<16x16xf32>, vector<16x16xf32>, vector<16x16xf32>, vector<16x16xf32>, vector<16x16xf32>, vector<16x16xf32>, vector<16x16xf32>, vector<16x16xf32>, vector<16x16xf32> -> vector<16x208xf32>
    %c0_6 = arith.constant 0 : index
    %c0_7 = arith.constant 0 : index
    %29 = vector.load %arg2[%c0_6, %c0_7] : memref<16x208xf32, #tpu.memory_space<vmem>>, vector<16x208xf32>
    tpu.vector_store %arg2[%c0_6, %c0_7], %28 {strides = array<i32>} : memref<16x208xf32, #tpu.memory_space<vmem>>, vector<16x208xf32>,
    return
  }
  func.func @transform_0(%arg0: i32) -> (i32, i32) {
    %c0_i32 = arith.constant 0 : i32
    %c0_i32_0 = arith.constant 0 : i32
    return %arg0, %c0_i32 : i32, i32
  }
  func.func @transform_1(%arg0: i32) -> (i32, i32) {
    %c0_i32 = arith.constant 0 : i32
    %c0_i32_0 = arith.constant 0 : i32
    return %arg0, %c0_i32 : i32, i32
  }
}

</mosaic_0001>

<bundles_post_ra>
// kernel: tpu_custom_call.1
= control target key start
LH: loop header
LB: loop body
LE: loop exit
PB: predicated region body
PF: predicated region fallthrough
CT: control target
= control target key end

     0   :  { %6 = vsyncpa [#allocation3], 0  ;;  %s918_s0 = inlined_call_operand.hbm [shape: f32[16,16], index: 0, kind: input, shape index: {}]   ;;  %s919_s1 = inlined_call_operand.hbm [shape: f32[16,208], index: 1, kind: output, shape index: {}]  }
   0x1   :  { %7 = vsyncpa [#allocation4], 0  ;;  %s723_s6 = smov [#allocation2]   ;;  %s675_s10 = scalar_lea.hbm %s918_s0, 256 }
   0x2   :  { %s13_s7 = sshll.u32 %s723_s6, 4  ;;  %p676_p0 = scmp.ne.s32.totalorder %s918_s0, %s675_s10  ;;  %s14_s7 = int_to_ptr.vmem [resolvable:$true] %s13_s7 }
   0x3   :  { %p679_p1 = scmp.lt.u32.totalorder %s675_s10, %s918_s0 }
   0x5   :  { %p681_p2 = pnand %p679_p1, %p676_p0 }
   0x7   :  { %684 = shalt.err (!%p681_p2)
}
   0x8   :  { %s685_s15 = scalar_lea.vmem %s14_s7, 256  ;;  %p690_p4 = scmp.lt.s32.totalorder %s14_s7, %s14_s7 }
   0x9   :  { %p686_p3 = scmp.ne.s32.totalorder %s14_s7, %s685_s15  ;;  %p691_p5 = scmp.lt.s32.totalorder %s685_s15, %s685_s15 }
   0xb   :  { %p692_p6 = por %p691_p5, %p690_p4 }
   0xd   :  { %p693_p7 = pnand %p692_p6, %p686_p3 }
   0xf   :  { %696 = shalt.err (!%p693_p7)
}
  0x10   :  { %s724_s16 = smov 128   ;;  %s725_s17 = smov 8  }
  0x11   :  { %19 = dma.hbm_to_vmem [thread:$0]  %s918_s0, 256, %s14_s7, [#allocation3], %s724_s16, %s724_s16, %s725_s17  }
  0x12   :  { %719 = dma.done.wait [#allocation3], 256  }
  0x13   :  { %720 = vsyncadd [#allocation3], 4294967040  ;;  %v763_v0 = vld [vmem:[#allocation2] sm:$0xff]  ;;  %v765_v1 = vld [vmem:[#allocation2 + $0x8] sm:$0xff]  ;;  %s726_s20 = smov 32   ;;  %s727_s21 = smov 16  }
  0x14   :  { %v27_v2 = vmul.f32 4.0, %v763_v0  ;;  %v25_v3 = vmul.f32 2.0, %v763_v0  ;;  %v28_v4 = vmul.f32 4.0, %v765_v1  ;;  %v26_v5 = vmul.f32 2.0, %v765_v1  ;;  %s728_s0 = smov 48   ;;  %s729_s22 = smov 64  }
  0x15   :  { %v30_v6 = vmul.f32 8.0, %v765_v1  ;;  %v29_v7 = vmul.f32 8.0, %v763_v0  ;;  %v32_v8 = vmul.f32 16.0, %v765_v1  ;;  %v31_v9 = vmul.f32 16.0, %v763_v0  ;;  %s730_s23 = smov 80   ;;  %s737_s24 = smov 96  }
  0x16   :  { %45 = vrot.lane.b32.xlu1 %v27_v2, %s726_s20  ;;  %37 = vrot.lane.b32.xlu0 %v25_v3, %s727_s21  ;;  %v34_v10 = vmul.f32 32.0, %v765_v1  ;;  %v33_v11 = vmul.f32 32.0, %v763_v0  ;;  %vm75_vm0 = vcmask 130048   ;;  %vm78_vm1 = vcmask 261120   ;;  %s738_s25 = smov 112   ;;  %s739_s26 = smov [#allocation5]  }
  0x17   :  { %vm81_vm2 = vcmask 392192   ;;  %vm84_vm3 = vcmask 523264   ;;  %vm87_vm4 = vcmask 654336   ;;  %v731_v52 = vmov 683565275   ;;  %s613_s27 = sshll.u32 %s739_s26, 4  ;;  %s614_s27 = int_to_ptr.vmem [resolvable:$true] %s613_s27 }
  0x18   :  { %v732_v56 = vmov 2475754826   ;;  %v733_v58 = vmov 2131351028   ;;  %v734_v60 = vmov 2102212464   ;;  %p702_p9 = scmp.lt.s32.totalorder %s614_s27, %s614_s27 }
  0x19   :  { %v735_v62 = vmov 920167782   ;;  %s697_s28 = scalar_lea.vmem %s614_s27, 512 }
  0x1a   :  { %47 = vrot.lane.b32.xlu1 %v28_v4, %s726_s20  ;;  %39 = vrot.lane.b32.xlu0 %v26_v5, %s727_s21  ;;  %p698_p8 = scmp.ne.s32.totalorder %s614_s27, %s697_s28  ;;  %p703_p10 = scmp.lt.s32.totalorder %s697_s28, %s697_s28 }
  0x1c   :  { %p704_p11 = por %p703_p10, %p702_p9 }
  0x1e   :  { %55 = vrot.lane.b32.xlu1 %v30_v6, %s728_s0  ;;  %53 = vrot.lane.b32.xlu0 %v29_v7, %s728_s0  ;;  %v736_v7 = vmov 1326507024   ;;  %p705_p12 = pnand %p704_p11, %p698_p8 }
  0x22   :  { %63 = vrot.lane.b32.xlu1 %v32_v8, %s729_s22  ;;  %61 = vrot.lane.b32.xlu0 %v31_v9, %s729_s22 }
  0x26   :  { %71 = vrot.lane.b32.xlu1 %v34_v10, %s730_s23  ;;  %69 = vrot.lane.b32.xlu0 %v33_v11, %s730_s23 }
  0x88   :  { %v46_v12 = vpop.permute.xlu1 %45  ;;  %v38_v13 = vpop.permute.xlu0 %37 }
  0x89   :  { %v76_v18 = vsel %vm75_vm0, %v763_v0, %v38_v13 }
  0x8a   :  { %v79_v23 = vsel %vm78_vm1, %v76_v18, %v46_v12 }
  0x8c   :  { %v48_v14 = vpop.permute.xlu1 %47  ;;  %v40_v15 = vpop.permute.xlu0 %39 }
  0x8d   :  { %v77_v19 = vsel %vm75_vm0, %v765_v1, %v40_v15 }
  0x8e   :  { %v80_v22 = vsel %vm78_vm1, %v77_v19, %v48_v14 }
  0x90   :  { %v56_v16 = vpop.permute.xlu1 %55  ;;  %v54_v17 = vpop.permute.xlu0 %53 }
  0x91   :  { %v83_v24 = vsel %vm81_vm2, %v80_v22, %v56_v16  ;;  %v82_v25 = vsel %vm81_vm2, %v79_v23, %v54_v17 }
  0x94   :  { %v64_v20 = vpop.permute.xlu1 %63  ;;  %v62_v21 = vpop.permute.xlu0 %61 }
  0x95   :  { %v86_v26 = vsel %vm84_vm3, %v83_v24, %v64_v20  ;;  %v85_v27 = vsel %vm84_vm3, %v82_v25, %v62_v21 }
  0x98   :  { %v72_v28 = vpop.permute.xlu1 %71  ;;  %v70_v29 = vpop.permute.xlu0 %69 }
  0x99   :  { %v798_v30 = vsel %vm87_vm4, %v86_v26, %v72_v28  ;;  %v801_v31 = vsel %vm87_vm4, %v85_v27, %v70_v29 }
  0x9a   :  { %v194_v32 = vand.u32 2147483647, %v798_v30  ;;  %v197_v33 = vand.u32 2139095040, %v798_v30  ;;  %v93_v34 = vand.u32 2139095040, %v801_v31  ;;  %v90_v37 = vand.u32 2147483647, %v801_v31 }
  0x9c   :  { %v198_v35 = vshrl.u32 %v197_v33, 23  ;;  %v201_v36 = vand.u32 8388607, %v194_v32  ;;  %v94_v38 = vshrl.u32 %v93_v34, 23  ;;  %v811_v43 = vand.u32 8388607, %v90_v37 }
  0x9e   :  { %v629_v39 = vadd.s32 4294967169, %v198_v35  ;;  %v625_v40 = vadd.s32 4294967169, %v94_v38  ;;  %v202_v42 = vor.u32 8388608, %v201_v36  ;;  %v98_v50 = vor.u32 8388608, %v811_v43 }
  0xa0   :  { %v204_v41 = vadd.s32 1, %v629_v39  ;;  %v100_v44 = vadd.s32 1, %v625_v40  ;;  %v813_v49 = vshll.u32 %v202_v42, 8 }
  0xa2   :  { %vm205_vm5 = vcmp.gt.s32.totalorder %v204_v41, 0  ;;  %vm101_vm6 = vcmp.gt.s32.totalorder %v100_v44, 0 }
  0xa3   :  { %v206_v45 = vsel %vm205_vm5, %v204_v41, 0  ;;  %v102_v48 = vsel %vm101_vm6, %v100_v44, 0 }
  0xa4   :  { %v207_v46 = vshrl.u32 %v206_v45, 5  ;;  %v208_v47 = vand.u32 31, %v206_v45  ;;  %v816_v54 = vshrl.u32 %v102_v48, 5  ;;  %v104_v55 = vand.u32 31, %v102_v48 }
  0xa6   :  { %v209_v51 = vsub.s32 32, %v208_v47  ;;  %v211_v53 = vshll.u32 %v731_v52, %v208_v47  ;;  %v214_v57 = vshll.u32 %v732_v56, %v208_v47  ;;  %v217_v59 = vshll.u32 %v733_v58, %v208_v47 }
  0xa7   :  { %v220_v61 = vshll.u32 %v734_v60, %v208_v47  ;;  %v223_v63 = vshll.u32 %v735_v62, %v208_v47  ;;  %vm226_vm7 = vcmp.lt.s32.totalorder %v207_v46, 1  ;;  %vm227_vm8 = vcmp.lt.s32.totalorder %v207_v46, 2 }
  0xa8   :  { %v212_v2 = vshrl.u32 %v732_v56, %v209_v51  ;;  %v215_v3 = vshrl.u32 %v733_v58, %v209_v51  ;;  %v218_v4 = vshrl.u32 %v734_v60, %v209_v51  ;;  %v210_v5 = vshrl.u32 %v731_v52, %v209_v51 }
  0xa9   :  { %v221_v6 = vshrl.u32 %v735_v62, %v209_v51  ;;  %v224_v8 = vshrl.u32 %v736_v7, %v209_v51  ;;  %v105_v12 = vsub.s32 32, %v104_v55  ;;  %vm228_vm9 = vcmp.lt.s32.totalorder %v207_v46, 3 }
  0xaa   :  { %v213_v9 = vor.u32 %v212_v2, %v211_v53  ;;  %v216_v10 = vor.u32 %v215_v3, %v214_v57  ;;  %v219_v11 = vor.u32 %v218_v4, %v217_v59  ;;  %vm229_vm10 = vcmp.lt.s32.totalorder %v207_v46, 4 }
  0xab   :  { %v222_v13 = vor.u32 %v221_v6, %v220_v61  ;;  %v225_v14 = vor.u32 %v224_v8, %v223_v63  ;;  %v107_v22 = vshll.u32 %v731_v52, %v104_v55  ;;  %v108_v25 = vshrl.u32 %v732_v56, %v105_v12 }
  0xac   :  { %v230_v15 = vsel %vm226_vm7, %v210_v5, %v213_v9  ;;  %v231_v16 = vsel %vm229_vm10, %v219_v11, 2102212464  ;;  %v234_v17 = vsel %vm226_vm7, %v213_v9, %v216_v10  ;;  %v238_v18 = vsel %vm226_vm7, %v216_v10, %v219_v11 }
  0xad   :  { %v232_v19 = vsel %vm228_vm9, %v216_v10, %v231_v16  ;;  %v235_v20 = vsel %vm229_vm10, %v222_v13, 920167782  ;;  %v239_v21 = vsel %vm229_vm10, %v225_v14, 1326507024  ;;  %v110_v26 = vshll.u32 %v732_v56, %v104_v55 }
  0xae   :  { %v236_v23 = vsel %vm228_vm9, %v219_v11, %v235_v20  ;;  %v240_v24 = vsel %vm228_vm9, %v222_v13, %v239_v21  ;;  %v233_v27 = vsel %vm227_vm8, %v230_v15, %v232_v19  ;;  %v111_v33 = vshrl.u32 %v733_v58, %v105_v12 }
  0xaf   :  { %v237_v28 = vsel %vm227_vm8, %v234_v17, %v236_v23  ;;  %v241_v29 = vsel %vm227_vm8, %v238_v18, %v240_v24  ;;  %v109_v39 = vor.u32 %v108_v25, %v107_v22  ;;  %v113_v41 = vshll.u32 %v733_v58, %v104_v55 }
  0xb0   :  { %v825_v34 = vmul.u32.u64.low %v813_v49, %v241_v29  ;;  %v826_v35 = vmul.u32.u64.high %v813_v49, %v241_v29, %v825_v34  ;;  %v829_v36 = vmul.u32.u64.low %v813_v49, %v237_v28  ;;  %v830_v38 = vmul.u32.u64.high %v813_v49, %v237_v28, %v829_v36 }
  0xb1   :  { %v112_v40 = vor.u32 %v111_v33, %v110_v26  ;;  %v114_v42 = vshrl.u32 %v734_v60, %v105_v12  ;;  %v116_v43 = vshll.u32 %v734_v60, %v104_v55  ;;  %v117_v44 = vshrl.u32 %v735_v62, %v105_v12 }
  0xb2   :  { %v120_v45 = vshrl.u32 %v736_v7, %v105_v12  ;;  %v138_v47 = vshll.u32 %v98_v50, 8  ;;  %v249_v46 = vmul.u32 %v813_v49, %v233_v27  ;;  %v106_v48 = vshrl.u32 %v731_v52, %v105_v12 }
  0xb3   :  { %v115_v51 = vor.u32 %v114_v42, %v113_v41  ;;  %v119_v53 = vshll.u32 %v735_v62, %v104_v55  ;;  %vm251_vm11 = vc.u32 %v826_v35, %v829_v36  ;;  %v252_v56 = vadd.s32 1, %v830_v38 }
  0xb4   :  { %v118_v57 = vor.u32 %v117_v44, %v116_v43  ;;  %vm122_vm12 = vcmp.lt.s32.totalorder %v816_v54, 1  ;;  %vm124_vm13 = vcmp.lt.s32.totalorder %v816_v54, 3  ;;  %vm125_vm14 = vcmp.lt.s32.totalorder %v816_v54, 4 }
  0xb5   :  { %v121_v59 = vor.u32 %v120_v45, %v119_v53  ;;  %v130_v58 = vsel %vm122_vm12, %v109_v39, %v112_v40  ;;  %v253_v50 = vsel %vm251_vm11, %v252_v56, %v830_v38  ;;  %v127_v60 = vsel %vm125_vm14, %v115_v51, 2102212464 }
  0xb6   :  { %v131_v49 = vsel %vm125_vm14, %v118_v57, 920167782  ;;  %v134_v52 = vsel %vm122_vm12, %v112_v40, %v115_v51  ;;  %v254_v61 = vadd.s32 %v253_v50, %v249_v46  ;;  %vm123_vm15 = vcmp.lt.s32.totalorder %v816_v54, 2 }
  0xb7   :  { %v132_v55 = vsel %vm124_vm13, %v115_v51, %v131_v49  ;;  %v135_v62 = vsel %vm125_vm14, %v121_v59, 1326507024  ;;  %v126_v63 = vsel %vm122_vm12, %v106_v48, %v109_v39  ;;  %v128_v2 = vsel %vm124_vm13, %v112_v40, %v127_v60 }
  0xb8   :  { %v133_v3 = vsel %vm123_vm15, %v130_v58, %v132_v55  ;;  %v136_v4 = vsel %vm124_vm13, %v118_v57, %v135_v62  ;;  %v255_v5 = vadd.s32 536870912, %v254_v61  ;;  %v129_v12 = vsel %vm123_vm15, %v126_v63, %v128_v2 }
  0xb9   :  { %v137_v6 = vsel %vm123_vm15, %v134_v52, %v136_v4  ;;  %v840_v7 = vmul.u32.u64.low %v138_v47, %v133_v3  ;;  %v841_v8 = vmul.u32.u64.high %v138_v47, %v133_v3, %v840_v7  ;;  %v145_v54 = vmul.u32 %v138_v47, %v129_v12 }
  0xba   :  { %v843_v9 = vmul.u32.u64.low %v138_v47, %v137_v6  ;;  %v844_v10 = vmul.u32.u64.high %v138_v47, %v137_v6, %v843_v9  ;;  %v256_v11 = vshrl.u32 %v255_v5, 30  ;;  %v250_v28 = vadd.s32 %v829_v36, %v826_v35 }
  0xbb   :  { %v148_v14 = vadd.s32 1, %v841_v8  ;;  %vm196_vm8 = vcmp.lt.s32.totalorder %v798_v30, 0  ;;  %vm195_vm9 = vcmp.le.f32.partialorder %v194_v32, 0.7853982  ;;  %vm92_vm10 = vcmp.lt.s32.totalorder %v801_v31, 0 }
  0xbc   :  { %v257_v13 = vshll.u32 %v256_v11, 30  ;;  %vm147_vm5 = vc.u32 %v844_v10, %v840_v7  ;;  %v146_v51 = vadd.s32 %v840_v7, %v844_v10  ;;  %v280_v36 = vsub.s32 4, %v256_v11 }
  0xbd   :  { %v149_v16 = vsel %vm147_vm5, %v148_v14, %v841_v8  ;;  %vm91_vm11 = vcmp.le.f32.partialorder %v90_v37, 0.7853982 }
  0xbe   :  { %v258_v15 = vsub.s32 %v254_v61, %v257_v13  ;;  %v150_v17 = vadd.s32 %v149_v16, %v145_v54  ;;  %v281_v61 = vsel %vm196_vm8, %v280_v36, %v256_v11 }
  0xbf   :  { %v283_v63 = vsel %vm195_vm9, 0, %v281_v61 }
  0xc0   :  { %v260_v18 = vsub.s32 0, %v258_v15  ;;  %v151_v19 = vadd.s32 536870912, %v150_v17  ;;  %v287_v6 = vadd.s32 3, %v283_v63  ;;  %v494_v10 = vand.u32 3, %v283_v63 }
  0xc2   :  { %v630_v20 = vmin.u32 %v260_v18, %v258_v15  ;;  %v152_v21 = vshrl.u32 %v151_v19, 30  ;;  %v288_v9 = vand.u32 3, %v287_v6  ;;  %vm496_vm13 = vcmp.eq.s32.totalorder %v494_v10, 0 }
  0xc3   :  { %vm499_vm15 = vcmp.eq.s32.totalorder %v494_v10, 2 }
  0xc4   :  { %v262_v22 = vclz %v630_v20  ;;  %v153_v23 = vshll.u32 %v152_v21, 30  ;;  %v176_v5 = vsub.s32 4, %v152_v21  ;;  %vm293_vm12 = vcmp.eq.s32.totalorder %v288_v9, 2 }
  0xc5   :  { %vm290_vm14 = vcmp.eq.s32.totalorder %v288_v9, 0  ;;  %vm289_vm5 = vcmp.lt.s32.totalorder %v288_v9, 2 }
  0xc6   :  { %v631_v24 = vadd.s32 4294967294, %v262_v22  ;;  %v154_v25 = vsub.s32 %v150_v17, %v153_v23  ;;  %v177_v8 = vsel %vm92_vm10, %v176_v5, %v152_v21 }
  0xc7   :  { %v179_v13 = vsel %vm91_vm11, 0, %v177_v8 }
  0xc8   :  { %vm632_vm6 = vcmp.lt.s32.totalorder %v631_v24, 0  ;;  %v156_v27 = vsub.s32 0, %v154_v25  ;;  %v183_v16 = vadd.s32 3, %v179_v13 }
  0xc9   :  { %v265_v26 = vsel %vm632_vm6, 0, %v631_v24  ;;  %vm286_vm6 = vweird.f32 %v798_v30  ;;  %v391_v24 = vand.u32 3, %v179_v13 }
  0xca   :  { %v266_v29 = vsub.s32 32, %v265_v26  ;;  %v270_v33 = vsub.s32 4294967266, %v265_v26  ;;  %v626_v34 = vmin.u32 %v156_v27, %v154_v25  ;;  %v267_v38 = vshll.u32 %v258_v15, %v265_v26 }
  0xcb   :  { %v184_v22 = vand.u32 3, %v183_v16 }
  0xcc   :  { %v268_v39 = vshrl.u32 %v250_v28, %v266_v29  ;;  %v271_v40 = vadd.s32 127, %v270_v33  ;;  %v158_v41 = vclz %v626_v34 }
  0xce   :  { %v269_v42 = vor.u32 %v268_v39, %v267_v38  ;;  %v272_v43 = vshll.u32 %v271_v40, 23  ;;  %v627_v44 = vadd.s32 4294967294, %v158_v41 }
  0xd0   :  { %v273_v45 = vor.u32 4788187, %v272_v43  ;;  %vm628_vm7 = vcmp.lt.s32.totalorder %v627_v44, 0  ;;  %v276_v46 = vcvt.s32.f32 %v269_v42 }
  0xd1   :  { %v161_v48 = vsel %vm628_vm7, 0, %v627_v44  ;;  %vm495_vm7 = vcmp.lt.s32.totalorder %v494_v10, 2 }
  0xd2   :  { %v274_v47 = vand.u32 2147483647, %v273_v45  ;;  %v162_v53 = vsub.s32 32, %v161_v48  ;;  %v166_v56 = vsub.s32 4294967266, %v161_v48  ;;  %v163_v57 = vshll.u32 %v154_v25, %v161_v48 }
  0xd4   :  { %v277_v35 = vmul.f32 %v276_v46, %v274_v47  ;;  %v164_v59 = vshrl.u32 %v146_v51, %v162_v53  ;;  %v167_v58 = vadd.s32 127, %v166_v56 }
  0xd6   :  { %v278_v50 = vxor.u32 2147483648, %v277_v35  ;;  %v165_v60 = vor.u32 %v164_v59, %v163_v57  ;;  %v168_v49 = vshll.u32 %v167_v58, 23 }
  0xd8   :  { %v279_v52 = vsel %vm196_vm8, %v278_v50, %v277_v35  ;;  %v169_v62 = vor.u32 4788187, %v168_v49  ;;  %v172_v3 = vcvt.s32.f32 %v165_v60  ;;  %vm189_vm8 = vcmp.eq.s32.totalorder %v184_v22, 2 }
  0xd9   :  { %v282_v55 = vsel %vm195_vm9, %v798_v30, %v279_v52  ;;  %vm186_vm9 = vcmp.eq.s32.totalorder %v184_v22, 0 }
  0xda   :  { %667 = vcosq.f32 %v282_v55  ;;  %v170_v2 = vand.u32 2147483647, %v169_v62 }
  0xdb   :  { %669 = vsinq.f32 %v282_v55 }
  0xdc   :  { %v173_v4 = vmul.f32 %v172_v3, %v170_v2 }
  0xde   :  { %v174_v7 = vxor.u32 2147483648, %v173_v4 }
  0xe0   :  { %v175_v32 = vsel %vm92_vm10, %v174_v7, %v173_v4  ;;  %vm393_vm10 = vcmp.eq.s32.totalorder %v391_v24, 0 }
  0xe1   :  { %v178_v11 = vsel %vm91_vm11, %v801_v31, %v175_v32  ;;  %vm396_vm11 = vcmp.eq.s32.totalorder %v391_v24, 2 }
  0xe2   :  { %671 = vcosq.f32 %v178_v11 }
  0xe3   :  { %673 = vsinq.f32 %v178_v11 }
  0xe4   :  { %v668_v12 = vpop.eup %667 }
  0xe5   :  { %v670_v14 = vpop.eup %669  ;;  %v294_v54 = vxor.u32 2147483648, %v668_v12 }
  0xe6   :  { %v291_v15 = vxor.u32 2147483648, %v670_v14 }
  0xe7   :  { %v295_v17 = vsel %vm293_vm12, %v294_v54, %v670_v14  ;;  %v501_v19 = vsel %vm499_vm15, %v294_v54, %v670_v14  ;;  %vm185_vm12 = vcmp.lt.s32.totalorder %v184_v22, 2  ;;  %vm590_vm15 = vcmask 785408  }
  0xe8   :  { %v292_v37 = vsel %vm290_vm14, %v668_v12, %v291_v15  ;;  %v498_v18 = vsel %vm496_vm13, %v668_v12, %v291_v15  ;;  %vm182_vm13 = vweird.f32 %v801_v31  ;;  %vm392_vm14 = vcmp.lt.s32.totalorder %v391_v24, 2 }
  0xe9   :  { %v296_v20 = vsel %vm289_vm5, %v292_v37, %v295_v17  ;;  %v502_v23 = vsel %vm495_vm7, %v498_v18, %v501_v19  ;;  %vm593_vm5 = vcmask 916480  }
  0xea   :  { %v297_v21 = vsel %vm286_vm6, nan, %v296_v20  ;;  %v503_v28 = vsel %vm286_vm6, nan, %v502_v23 }
  0xeb   :  { %508 = vrot.lane.b32.xlu1 %v297_v21, %s727_s21 }
  0xec   :  { %v672_v25 = vpop.eup %671 }
  0xed   :  { %v674_v26 = vpop.eup %673  ;;  %v190_v27 = vxor.u32 2147483648, %v672_v25 }
  0xee   :  { %v187_v29 = vxor.u32 2147483648, %v674_v26 }
  0xef   :  { %516 = vrot.lane.b32.xlu1 %v503_v28, %s726_s20  ;;  %v191_v33 = vsel %vm189_vm8, %v190_v27, %v674_v26  ;;  %v398_v38 = vsel %vm396_vm11, %v190_v27, %v674_v26 }
  0xf0   :  { %v188_v30 = vsel %vm186_vm9, %v672_v25, %v187_v29  ;;  %v395_v34 = vsel %vm393_vm10, %v672_v25, %v187_v29 }
  0xf1   :  { %v192_v39 = vsel %vm185_vm12, %v188_v30, %v191_v33  ;;  %v399_v41 = vsel %vm392_vm14, %v395_v34, %v398_v38 }
  0xf2   :  { %v193_v40 = vsel %vm182_vm13, nan, %v192_v39  ;;  %v400_v42 = vsel %vm182_vm13, nan, %v399_v41 }
  0xf3   :  { %522 = vrot.lane.b32.xlu1 %v297_v21, %s726_s20  ;;  %506 = vrot.lane.b32.xlu0 %v193_v40, %s727_s21 }
  0xf7   :  { %528 = vrot.lane.b32.xlu1 %v503_v28, %s728_s0  ;;  %514 = vrot.lane.b32.xlu0 %v400_v42, %s726_s20 }
  0xfb   :  { %552 = vrot.lane.b32.xlu1 %v503_v28, %s730_s23  ;;  %520 = vrot.lane.b32.xlu0 %v193_v40, %s726_s20 }
  0xff   :  { %558 = vrot.lane.b32.xlu1 %v297_v21, %s730_s23  ;;  %526 = vrot.lane.b32.xlu0 %v400_v42, %s728_s0 }
 0x103   :  { %534 = vrot.lane.b32.xlu1 %v297_v21, %s728_s0  ;;  %550 = vrot.lane.b32.xlu0 %v400_v42, %s730_s23 }
 0x107   :  { %564 = vrot.lane.b32.xlu1 %v503_v28, %s737_s24  ;;  %556 = vrot.lane.b32.xlu0 %v193_v40, %s730_s23 }
 0x10b   :  { %540 = vrot.lane.b32.xlu1 %v503_v28, %s729_s22  ;;  %532 = vrot.lane.b32.xlu0 %v193_v40, %s728_s0 }
 0x10f   :  { %570 = vrot.lane.b32.xlu1 %v297_v21, %s737_s24  ;;  %562 = vrot.lane.b32.xlu0 %v400_v42, %s737_s24 }
 0x113   :  { %546 = vrot.lane.b32.xlu1 %v297_v21, %s729_s22  ;;  %538 = vrot.lane.b32.xlu0 %v400_v42, %s729_s22 }
 0x117   :  { %576 = vrot.lane.b32.xlu1 %v503_v28, %s738_s25  ;;  %568 = vrot.lane.b32.xlu0 %v193_v40, %s737_s24 }
 0x11b   :  { %544 = vrot.lane.b32.xlu0 %v193_v40, %s729_s22 }
 0x11f   :  { %574 = vrot.lane.b32.xlu0 %v400_v42, %s738_s25 }
 0x15d   :  { %v509_v31 = vpop.permute.xlu1 %508 }
 0x15e   :  { %v581_v60 = vsel %vm75_vm0, %v765_v1, %v509_v31 }
 0x161   :  { %v517_v43 = vpop.permute.xlu1 %516 }
 0x162   :  { %v583_v49 = vsel %vm78_vm1, %v581_v60, %v517_v43 }
 0x165   :  { %v523_v44 = vpop.permute.xlu1 %522  ;;  %v507_v45 = vpop.permute.xlu0 %506 }
 0x166   :  { %v585_v61 = vsel %vm81_vm2, %v583_v49, %v523_v44  ;;  %v580_v7 = vsel %vm75_vm0, %v763_v0, %v507_v45 }
 0x169   :  { %v529_v47 = vpop.permute.xlu1 %528  ;;  %v515_v46 = vpop.permute.xlu0 %514 }
 0x16a   :  { %v587_v62 = vsel %vm84_vm3, %v585_v61, %v529_v47  ;;  %v582_v9 = vsel %vm78_vm1, %v580_v7, %v515_v46 }
 0x16d   :  { %v553_v48 = vpop.permute.xlu1 %552  ;;  %v521_v51 = vpop.permute.xlu0 %520 }
 0x16e   :  { %v584_v12 = vsel %vm81_vm2, %v582_v9, %v521_v51 }
 0x171   :  { %v559_v53 = vpop.permute.xlu1 %558  ;;  %v527_v56 = vpop.permute.xlu0 %526 }
 0x172   :  { %v597_v1 = vsel %vm75_vm0, %v553_v48, %v559_v53  ;;  %v586_v13 = vsel %vm84_vm3, %v584_v12, %v527_v56 }
 0x175   :  { %v535_v35 = vpop.permute.xlu1 %534  ;;  %v551_v36 = vpop.permute.xlu0 %550 }
 0x176   :  { %v589_v63 = vsel %vm87_vm4, %v587_v62, %v535_v35 }
 0x179   :  { %v565_v57 = vpop.permute.xlu1 %564  ;;  %v557_v59 = vpop.permute.xlu0 %556 }
 0x17a   :  { %v599_v6 = vsel %vm78_vm1, %v597_v1, %v565_v57  ;;  %v596_v16 = vsel %vm75_vm0, %v551_v36, %v557_v59 }
 0x17d   :  { %v541_v58 = vpop.permute.xlu1 %540  ;;  %v533_v50 = vpop.permute.xlu0 %532 }
 0x17e   :  { %v592_v2 = vsel %vm590_vm15, %v589_v63, %v541_v58  ;;  %v588_v14 = vsel %vm87_vm4, %v586_v13, %v533_v50 }
 0x181   :  { %v571_v52 = vpop.permute.xlu1 %570  ;;  %v563_v55 = vpop.permute.xlu0 %562 }
 0x182   :  { %v601_v32 = vsel %vm81_vm2, %v599_v6, %v571_v52  ;;  %v598_v17 = vsel %vm78_vm1, %v596_v16, %v563_v55 }
 0x185   :  { %v547_v3 = vpop.permute.xlu1 %546  ;;  %v539_v4 = vpop.permute.xlu0 %538 }
 0x186   :  { %v595_v5 = vsel %vm593_vm5, %v592_v2, %v547_v3  ;;  %v591_v54 = vsel %vm590_vm15, %v588_v14, %v539_v4 }
 0x187   :  { %606 = vst [vmem:[#allocation5 + $0x10] sm:$0xff] %v595_v5 }
 0x189   :  { %v577_v8 = vpop.permute.xlu1 %576  ;;  %v569_v10 = vpop.permute.xlu0 %568 }
 0x18a   :  { %v603_v11 = vsel %vm84_vm3, %v601_v32, %v577_v8  ;;  %v600_v37 = vsel %vm81_vm2, %v598_v17, %v569_v10 }
 0x18b   :  { %607 = vst.msk [vmem:[#allocation5 + $0x18] sm:$0xff] %vm87_vm4, %v603_v11 }
 0x18d   :  { %v545_v15 = vpop.permute.xlu0 %544 }
 0x18e   :  { %v594_v0 = vsel %vm593_vm5, %v591_v54, %v545_v15 }
 0x18f   :  { %604 = vst [vmem:[#allocation5] sm:$0xff] %v594_v0 }
 0x191   :  { %v575_v18 = vpop.permute.xlu0 %574 }
 0x192   :  { %v602_v19 = vsel %vm84_vm3, %v600_v37, %v575_v18 }
 0x193   :  { %605 = vst.msk [vmem:[#allocation5 + $0x8] sm:$0xff] %vm87_vm4, %v602_v19 }
 0x194   :  { %708 = shalt.err (!%p705_p12)
}
 0x195   :  { %s709_s2 = scalar_lea.hbm %s919_s1, 512 }
 0x196   :  { %p710_p13 = scmp.ne.s32.totalorder %s919_s1, %s709_s2  ;;  %p713_p0 = scmp.lt.u32.totalorder %s709_s2, %s919_s1 }
 0x198   :  { %p715_p1 = pnand %p713_p0, %p710_p13 }
 0x19a   :  { %718 = shalt.err (!%p715_p1)
}
 0x19b   :  { %s740_s7 = smov 256  }
 0x19c   :  { %619 = dma.vmem_to_hbm [thread:$0]  %s614_s27, 512, %s919_s1, [#allocation4], %s740_s7, %s740_s7, %s727_s21  }
 0x19d   :  { %721 = dma.done.wait [#allocation4], 512  }
 0x19e   :  { %722 = vsyncadd [#allocation4], 4294966784 }
 0x19f   :  { %623 = vsyncpa [#allocation3], 1 }
 0x1a0   :  { %624 = vsyncpa [#allocation4], 1 }

</bundles_post_ra>
